<compile_context>
chip_gen: v6e
topology: v6e:2x2x1
jax: 0.10.0
libtpu: 0.0.40
codegen_flags: <defaults>
</compile_context>

<pallas_src>
import functools

import jax
import jax.numpy as jnp
from jax import lax
from jax.experimental import pallas as pl
from jax.experimental.pallas import tpu as pltpu


def _round_up(x, m):
    return ((x + m - 1) // m) * m


def bcq_fc_kernel(state_ref, w1_ref, w2_ref, w3_ref, bias_ref, out_ref, *,
                  num_actions):
    cdt = w1_ref.dtype                       # compute dtype for MXU (bf16)
    n1 = w1_ref.shape[1]                     # 256
    n2 = w2_ref.shape[1]                     # 128
    n3 = w3_ref.shape[1]                     # 128 (lane-dense)

    x = state_ref[...].astype(cdt)           # (TB, K)
    b = bias_ref[...]                        # (3, 256) f32, packed biases

    # Fused layer 1: [q1 | i1]
    h = jnp.dot(x, w1_ref[...], preferred_element_type=jnp.float32)
    h = jnp.maximum(h + b[0:1, :n1], 0.0)    # (TB, 256)

    # Fused layer 2: blockdiag(q2, i2)
    h = jnp.dot(h.astype(cdt), w2_ref[...], preferred_element_type=jnp.float32)
    h = jnp.maximum(h + b[1:2, :n2], 0.0)    # (TB, 128)

    # Fused layer 3: blockdiag(q3, i3), N padded to 128
    y = jnp.dot(h.astype(cdt), w3_ref[...], preferred_element_type=jnp.float32)
    y = y + b[2:3, :n3]                      # (TB, 128)

    # Masked log-softmax over the i-branch columns (lanes [A, 2A)).
    # Mask before the exp for robustness; no minor-dim slicing in-kernel.
    col = lax.broadcasted_iota(jnp.int32, y.shape, 1)
    i_mask = (col >= num_actions) & (col < 2 * num_actions)
    neg_inf = jnp.float32(-jnp.inf)
    m = jnp.max(jnp.where(i_mask, y, neg_inf), axis=1, keepdims=True)
    shifted = y - m
    p = jnp.exp(jnp.where(i_mask, shifted, neg_inf))
    s = jnp.sum(p, axis=1, keepdims=True)
    logp = shifted - jnp.log(s)

    # One packed, lane-dense writeback: row 0 = raw logits, row 1 = log-softmax.
    out_ref[0] = y
    out_ref[1] = logp


def prepare_params(params, dtype=jnp.bfloat16):
    """ONE-TIME fusion of the two 3-layer branches into 3 fused matmuls.

    Call once; reuse the returned dict across forward calls (hot path does no
    weight construction). Weights are (in_features, out_features); biases 1-D.
    """
    q1w, q1b = params["q1"]; q2w, q2b = params["q2"]; q3w, q3b = params["q3"]
    i1w, i1b = params["i1"]; i2w, i2b = params["i2"]; i3w, i3b = params["i3"]

    state_dim, h1 = q1w.shape
    h2 = q2w.shape[1]
    num_actions = q3w.shape[1]
    n1, n2 = 2 * h1, 2 * h2
    n3 = _round_up(2 * num_actions, 128)          # lane-dense output width

    w1 = jnp.concatenate([q1w, i1w], axis=1)      # (108, 256)

    w2 = jnp.zeros((n1, n2), jnp.float32)
    w2 = w2.at[:h1, :h2].set(q2w).at[h1:, h2:].set(i2w)          # (256, 128)

    w3 = jnp.zeros((n2, n3), jnp.float32)
    w3 = w3.at[:h2, :num_actions].set(q3w)
    w3 = w3.at[h2:, num_actions:2 * num_actions].set(i3w)        # (128, 128)

    bw = max(n1, n2, n3)
    bias = jnp.zeros((3, bw), jnp.float32)
    bias = bias.at[0, :n1].set(jnp.concatenate([q1b, i1b]))
    bias = bias.at[1, :n2].set(jnp.concatenate([q2b, i2b]))
    bias = bias.at[2, :2 * num_actions].set(jnp.concatenate([q3b, i3b]))

    return {
        "w1": jax.device_put(w1.astype(dtype)),
        "w2": jax.device_put(w2.astype(dtype)),
        "w3": jax.device_put(w3.astype(dtype)),
        "bias": jax.device_put(bias),             # biases stay f32
        "num_actions": num_actions,
    }


@functools.partial(jax.jit, static_argnames=("num_actions", "block_b"))
def _bcq_fc_call(state, w1, w2, w3, bias, *, num_actions, block_b):
    B, K = state.shape
    n3 = w3.shape[1]

    # Batch tile: fill MXU rows when the batch is large, stay tight when small.
    tb = min(block_b, _round_up(B, 8))
    b_pad = _round_up(B, tb)
    if b_pad != B:
        state = jnp.pad(state, ((0, b_pad - B), (0, 0)))
    grid = (b_pad // tb,)

    const2 = lambda i: (0, 0)
    out = pl.pallas_call(
        functools.partial(bcq_fc_kernel, num_actions=num_actions),
        out_shape=jax.ShapeDtypeStruct((2, b_pad, n3), jnp.float32),
        grid=grid,
        in_specs=[
            pl.BlockSpec((tb, K), lambda i: (i, 0)),   # state: tiled over batch
            pl.BlockSpec(w1.shape, const2),            # weights/bias: constant
            pl.BlockSpec(w2.shape, const2),            # index -> DMA'd once,
            pl.BlockSpec(w3.shape, const2),            # VMEM-resident.
            pl.BlockSpec(bias.shape, const2),
        ],
        out_specs=pl.BlockSpec((2, tb, n3), lambda i: (0, i, 0)),
        compiler_params=pltpu.CompilerParams(
            dimension_semantics=("parallel",)),        # v7x: 2 TCs split batch
    )(state, w1, w2, w3, bias)

    q_vals = out[0, :B, :num_actions]
    i_logits = out[0, :B, num_actions:2 * num_actions]
    log_probs = out[1, :B, num_actions:2 * num_actions]
    return q_vals, log_probs, i_logits


def bcq_fc_forward(state, fused, *, block_b=256):
    """state: (B, state_dim) f32. Returns (q_values, log_probs, i_logits)."""
    return _bcq_fc_call(state, fused["w1"], fused["w2"], fused["w3"],
                        fused["bias"], num_actions=fused["num_actions"],
                        block_b=block_b)


def init_linear(key, in_features, out_features):
    """PyTorch-style init U(-1/sqrt(fan_in), 1/sqrt(fan_in)); weight stored
    pre-transposed as (in_features, out_features)."""
    kw, kb = jax.random.split(key)
    bound = 1.0 / jnp.sqrt(jnp.float32(in_features))
    w = jax.random.uniform(kw, (in_features, out_features), jnp.float32,
                           minval=-bound, maxval=bound)
    b = jax.random.uniform(kb, (out_features,), jnp.float32,
                           minval=-bound, maxval=bound)
    return w, b


if __name__ == "__main__":
    state_dim = 108
    num_actions = 3

    root = jax.random.PRNGKey(0)
    k_small, k_large, k_params = jax.random.split(root, 3)
    keys = jax.random.split(k_params, 6)

    params = {
        "q1": init_linear(keys[0], state_dim, 128),
        "q2": init_linear(keys[1], 128, 64),
        "q3": init_linear(keys[2], 64, num_actions),
        "i1": init_linear(keys[3], state_dim, 128),
        "i2": init_linear(keys[4], 128, 64),
        "i3": init_linear(keys[5], 64, num_actions),
    }

    # One-time weight fusion (hoisted out of the hot path), bf16 weights.
    fused = prepare_params(params, dtype=jnp.bfloat16)

    def ref_forward(x, weight_dtype=None):
        """Pure-JAX reference of the original two-branch network.
        weight_dtype=None  -> full f32 (HIGHEST precision) reference.
        weight_dtype=bf16  -> same bf16-weight / f32-accumulate math as kernel."""
        def lin(name, h):
            w, b = params[name]
            if weight_dtype is None:
                return jnp.dot(h, w, precision=lax.Precision.HIGHEST) + b
            return jnp.dot(h.astype(weight_dtype), w.astype(weight_dtype),
                           preferred_element_type=jnp.float32) + b
        q = jax.nn.relu(lin("q1", x)); q = jax.nn.relu(lin("q2", q)); q = lin("q3", q)
        i = jax.nn.relu(lin("i1", x)); i = jax.nn.relu(lin("i2", i)); i = lin("i3", i)
        return q, jax.nn.log_softmax(i, axis=1), i

    # batch=8: single grid step; batch=300: exercises batch padding + 2-step grid.
    for batch, key in ((8, k_small), (300, k_large)):
        state = jax.random.normal(key, (batch, state_dim), jnp.float32)

        q_vals, log_probs, i_logits = bcq_fc_forward(state, fused)
        jax.block_until_ready((q_vals, log_probs, i_logits))
        assert q_vals.shape == (batch, num_actions)
        assert log_probs.shape == (batch, num_actions)
        assert i_logits.shape == (batch, num_actions)

        # Tight check vs a reference using the same bf16-weight / f32-acc math.
        rq, rlp, ri = ref_forward(state, weight_dtype=jnp.bfloat16)
        for got, want in ((q_vals, rq), (log_probs, rlp), (i_logits, ri)):
            assert jnp.allclose(got, want, atol=1e-4, rtol=1e-4), \
                "bf16-math check failed"

        # Loose sanity check vs the original full-f32 module semantics
        # (tolerance accounts for bf16 weight storage).
        rq, rlp, ri = ref_forward(state, weight_dtype=None)
        for got, want in ((q_vals, rq), (log_probs, rlp), (i_logits, ri)):
            assert jnp.allclose(got, want, atol=1e-1, rtol=1e-1), \
                "f32 semantics sanity check failed"

    print("KERNEL_OK")
</pallas_src>

<mosaic_0001>
module attributes {stable_mosaic.version = 11 : i64} {
  func.func @bcq_fc_kernel(%arg0: i32, %arg1: memref<8x108xf32, #tpu.memory_space<vmem>>, %arg2: memref<108x256xbf16, #tpu.memory_space<vmem>>, %arg3: memref<256x128xbf16, #tpu.memory_space<vmem>>, %arg4: memref<128x128xbf16, #tpu.memory_space<vmem>>, %arg5: memref<3x256xf32, #tpu.memory_space<vmem>>, %arg6: memref<2x8x128xf32, #tpu.memory_space<vmem>>) attributes {dimension_semantics = [#tpu.dimension_semantics<parallel>], iteration_bounds = array<i64: 1>, scalar_prefetch = 0 : i64, scratch_operands = 0 : i64, tpu.core_type = #tpu.core_type<tc>, window_params = [{transform_indices = @transform_0, window_bounds = array<i64: 8, 108>}, {pipeline_mode = #tpu.pipeline_mode<synchronous>, transform_indices = @transform_1, window_bounds = array<i64: 108, 256>}, {pipeline_mode = #tpu.pipeline_mode<synchronous>, transform_indices = @transform_2, window_bounds = array<i64: 256, 128>}, {pipeline_mode = #tpu.pipeline_mode<synchronous>, transform_indices = @transform_3, window_bounds = array<i64: 128, 128>}, {pipeline_mode = #tpu.pipeline_mode<synchronous>, transform_indices = @transform_4, window_bounds = array<i64: 3, 256>}, {transform_indices = @transform_5, window_bounds = array<i64: 2, 8, 128>}]} {
    %c0 = arith.constant 0 : index
    %c0_0 = arith.constant 0 : index
    %0 = vector.load %arg1[%c0, %c0_0] : memref<8x108xf32, #tpu.memory_space<vmem>>, vector<8x108xf32>
    %1 = arith.truncf %0 : vector<8x108xf32> to vector<8x108xbf16>
    %c0_1 = arith.constant 0 : index
    %c0_2 = arith.constant 0 : index
    %2 = vector.load %arg5[%c0_1, %c0_2] : memref<3x256xf32, #tpu.memory_space<vmem>>, vector<3x256xf32>
    %c0_3 = arith.constant 0 : index
    %c0_4 = arith.constant 0 : index
    %3 = vector.load %arg2[%c0_3, %c0_4] : memref<108x256xbf16, #tpu.memory_space<vmem>>, vector<108x256xbf16>
    %cst = arith.constant dense<0.000000e+00> : vector<8x256xf32>
    %4 = tpu.matmul %1, %3, %cst {dimension_numbers = #tpu.dot_dimension_numbers<[1], [0], [0], [1], [0, 0, 1, 1], [], []>} : vector<8x108xbf16>, vector<108x256xbf16>, vector<8x256xf32> -> vector<8x256xf32>
    %5 = vector.extract_strided_slice %2 {offsets = [0, 0], sizes = [1, 256], strides = [1, 1]} : vector<3x256xf32> to vector<1x256xf32>
    %6 = vector.broadcast %5 : vector<1x256xf32> to vector<8x256xf32>
    %7 = arith.addf %4, %6 : vector<8x256xf32>
    %cst_5 = arith.constant 0.000000e+00 : f32
    %8 = vector.broadcast %cst_5 : f32 to vector<8x256xf32>
    %9 = arith.maximumf %7, %8 : vector<8x256xf32>
    %10 = arith.truncf %9 : vector<8x256xf32> to vector<8x256xbf16>
    %c0_6 = arith.constant 0 : index
    %c0_7 = arith.constant 0 : index
    %11 = vector.load %arg3[%c0_6, %c0_7] : memref<256x128xbf16, #tpu.memory_space<vmem>>, vector<256x128xbf16>
    %cst_8 = arith.constant dense<0.000000e+00> : vector<8x128xf32>
    %12 = tpu.matmul %10, %11, %cst_8 {dimension_numbers = #tpu.dot_dimension_numbers<[1], [0], [0], [1], [0, 0, 1, 1], [], []>} : vector<8x256xbf16>, vector<256x128xbf16>, vector<8x128xf32> -> vector<8x128xf32>
    %13 = vector.extract_strided_slice %2 {offsets = [1, 0], sizes = [1, 128], strides = [1, 1]} : vector<3x256xf32> to vector<1x128xf32>
    %14 = vector.broadcast %13 : vector<1x128xf32> to vector<8x128xf32>
    %15 = arith.addf %12, %14 : vector<8x128xf32>
    %cst_9 = arith.constant 0.000000e+00 : f32
    %16 = vector.broadcast %cst_9 : f32 to vector<8x128xf32>
    %17 = arith.maximumf %15, %16 : vector<8x128xf32>
    %18 = arith.truncf %17 : vector<8x128xf32> to vector<8x128xbf16>
    %c0_10 = arith.constant 0 : index
    %c0_11 = arith.constant 0 : index
    %19 = vector.load %arg4[%c0_10, %c0_11] : memref<128x128xbf16, #tpu.memory_space<vmem>>, vector<128x128xbf16>
    %cst_12 = arith.constant dense<0.000000e+00> : vector<8x128xf32>
    %20 = tpu.matmul %18, %19, %cst_12 {dimension_numbers = #tpu.dot_dimension_numbers<[1], [0], [0], [1], [0, 0, 1, 1], [], []>} : vector<8x128xbf16>, vector<128x128xbf16>, vector<8x128xf32> -> vector<8x128xf32>
    %21 = vector.extract_strided_slice %2 {offsets = [2, 0], sizes = [1, 128], strides = [1, 1]} : vector<3x256xf32> to vector<1x128xf32>
    %22 = vector.broadcast %21 : vector<1x128xf32> to vector<8x128xf32>
    %23 = arith.addf %20, %22 : vector<8x128xf32>
    %24 = tpu.iota {dimensions = array<i32: 1>} : vector<8x128xi32>
    %c3_i32 = arith.constant 3 : i32
    %25 = vector.broadcast %c3_i32 : i32 to vector<8x128xi32>
    %26 = arith.cmpi sge, %24, %25 : vector<8x128xi32>
    %c6_i32 = arith.constant 6 : i32
    %27 = vector.broadcast %c6_i32 : i32 to vector<8x128xi32>
    %28 = arith.cmpi slt, %24, %27 : vector<8x128xi32>
    %29 = arith.andi %26, %28 : vector<8x128xi1>
    %cst_13 = arith.constant 0xFF800000 : f32
    %30 = vector.broadcast %cst_13 : f32 to vector<8x128xf32>
    %31 = arith.select %29, %23, %30 : vector<8x128xi1>, vector<8x128xf32>
    %cst_14 = arith.constant dense<0xFF800000> : vector<8xf32>
    %32 = vector.multi_reduction <maximumf>, %31, %cst_14 [1] : vector<8x128xf32> to vector<8xf32>
    %33 = vector.shape_cast %32 : vector<8xf32> to vector<8x1xf32>
    %34 = vector.broadcast %33 : vector<8x1xf32> to vector<8x128xf32>
    %35 = arith.subf %23, %34 : vector<8x128xf32>
    %cst_15 = arith.constant 0xFF800000 : f32
    %36 = vector.broadcast %cst_15 : f32 to vector<8x128xf32>
    %37 = arith.select %29, %35, %36 : vector<8x128xi1>, vector<8x128xf32>
    %38 = math.exp %37 : vector<8x128xf32>
    %cst_16 = arith.constant dense<0.000000e+00> : vector<8xf32>
    %39 = vector.multi_reduction <add>, %38, %cst_16 [1] : vector<8x128xf32> to vector<8xf32>
    %40 = vector.shape_cast %39 : vector<8xf32> to vector<8x1xf32>
    %41 = math.log %40 : vector<8x1xf32>
    %42 = vector.broadcast %41 : vector<8x1xf32> to vector<8x128xf32>
    %43 = arith.subf %35, %42 : vector<8x128xf32>
    %c0_17 = arith.constant 0 : index
    %c0_18 = arith.constant 0 : index
    %c0_19 = arith.constant 0 : index
    %44 = vector.load %arg6[%c0_17, %c0_18, %c0_19] : memref<2x8x128xf32, #tpu.memory_space<vmem>>, vector<1x8x128xf32>
    %45 = vector.shape_cast %44 : vector<1x8x128xf32> to vector<8x128xf32>
    %46 = vector.shape_cast %23 : vector<8x128xf32> to vector<1x8x128xf32>
    tpu.vector_store %arg6[%c0_17, %c0_18, %c0_19], %46 {strides = array<i32>} : memref<2x8x128xf32, #tpu.memory_space<vmem>>, vector<1x8x128xf32>,
    %c1 = arith.constant 1 : index
    %c0_20 = arith.constant 0 : index
    %c0_21 = arith.constant 0 : index
    %47 = vector.load %arg6[%c1, %c0_20, %c0_21] : memref<2x8x128xf32, #tpu.memory_space<vmem>>, vector<1x8x128xf32>
    %48 = vector.shape_cast %47 : vector<1x8x128xf32> to vector<8x128xf32>
    %49 = vector.shape_cast %43 : vector<8x128xf32> to vector<1x8x128xf32>
    tpu.vector_store %arg6[%c1, %c0_20, %c0_21], %49 {strides = array<i32>} : memref<2x8x128xf32, #tpu.memory_space<vmem>>, vector<1x8x128xf32>,
    return
  }
  func.func @transform_0(%arg0: i32) -> (i32, i32) {
    %c0_i32 = arith.constant 0 : i32
    %c0_i32_0 = arith.constant 0 : i32
    return %arg0, %c0_i32 : i32, i32
  }
  func.func @transform_1(%arg0: i32) -> (i32, i32) {
    %c0_i32 = arith.constant 0 : i32
    %c0_i32_0 = arith.constant 0 : i32
    %c0_i32_1 = arith.constant 0 : i32
    return %c0_i32, %c0_i32_0 : i32, i32
  }
  func.func @transform_2(%arg0: i32) -> (i32, i32) {
    %c0_i32 = arith.constant 0 : i32
    %c0_i32_0 = arith.constant 0 : i32
    %c0_i32_1 = arith.constant 0 : i32
    return %c0_i32, %c0_i32_0 : i32, i32
  }
  func.func @transform_3(%arg0: i32) -> (i32, i32) {
    %c0_i32 = arith.constant 0 : i32
    %c0_i32_0 = arith.constant 0 : i32
    %c0_i32_1 = arith.constant 0 : i32
    return %c0_i32, %c0_i32_0 : i32, i32
  }
  func.func @transform_4(%arg0: i32) -> (i32, i32) {
    %c0_i32 = arith.constant 0 : i32
    %c0_i32_0 = arith.constant 0 : i32
    %c0_i32_1 = arith.constant 0 : i32
    return %c0_i32, %c0_i32_0 : i32, i32
  }
  func.func @transform_5(%arg0: i32) -> (i32, i32, i32) {
    %c0_i32 = arith.constant 0 : i32
    %c0_i32_0 = arith.constant 0 : i32
    %c0_i32_1 = arith.constant 0 : i32
    return %c0_i32, %arg0, %c0_i32_0 : i32, i32, i32
  }
}

</mosaic_0001>

<bundles_post_ra>
// kernel: _bcq_fc_call.1
= control target key start
LH: loop header
LB: loop body
LE: loop exit
PB: predicated region body
PF: predicated region fallthrough
CT: control target
= control target key end

     0   :  { %10 = vsyncpa [#allocation3], 0  ;;  %s877_s0 = inlined_call_operand.hbm [shape: f32[8,108], index: 0, kind: input, shape index: {}]   ;;  %s878_s1 = inlined_call_operand.hbm [shape: bf16[108,256], index: 1, kind: input, shape index: {}]   ;;  %s879_s2 = inlined_call_operand.hbm [shape: bf16[256,128], index: 2, kind: input, shape index: {}]   ;;  %s880_s3 = inlined_call_operand.hbm [shape: bf16[128,128], index: 3, kind: input, shape index: {}]   ;;  %s881_s4 = inlined_call_operand.hbm [shape: f32[3,256], index: 4, kind: input, shape index: {}]   ;;  %s882_s5 = inlined_call_operand.vmem [shape: f32[2,8,128], index: 5, kind: output, shape index: {}]  }
   0x1   :  { %11 = vsyncpa [#allocation5], 0 }
   0x2   :  { %12 = vsyncpa [#allocation8], 0  ;;  %s813_s18 = smov [#allocation4]  }
   0x3   :  { %s28_s19 = sshll.u32 %s813_s18, 4  ;;  %s29_s19 = int_to_ptr.vmem [resolvable:$true] %s28_s19 }
   0x4   :  { %s715_s20 = scalar_lea.vmem %s29_s19, 1792  ;;  %p720_p1 = scmp.lt.s32.totalorder %s29_s19, %s29_s19 }
   0x5   :  { %p716_p0 = scmp.ne.s32.totalorder %s29_s19, %s715_s20  ;;  %p721_p2 = scmp.lt.s32.totalorder %s715_s20, %s715_s20 }
   0x7   :  { %p722_p3 = por %p721_p2, %p720_p1 }
   0x9   :  { %p723_p4 = pnand %p722_p3, %p716_p0 }
   0xb   :  { %726 = shalt.err (!%p723_p4)
}
   0xc   :  { %s814_s21 = smov 128   ;;  %s815_s22 = smov 8  }
   0xd   :  { %34 = dma.hbm_to_vmem [thread:$0]  %s878_s1, 1792, %s29_s19, [#allocation5], %s814_s21, %s814_s21, %s815_s22  }
   0xe   :  { %s816_s25 = smov [#allocation7]   ;;  %s817_s27 = smov [#allocation2]  }
   0xf   :  { %s52_s26 = sshll.u32 %s816_s25, 4  ;;  %s19_s28 = sshll.u32 %s817_s27, 4  ;;  %s53_s26 = int_to_ptr.vmem [resolvable:$true] %s52_s26  ;;  %s20_s28 = int_to_ptr.vmem [resolvable:$true] %s19_s28 }
  0x10   :  { %s735_s29 = scalar_lea.vmem %s53_s26, 1024  ;;  %p740_p6 = scmp.lt.s32.totalorder %s53_s26, %s53_s26 }
  0x11   :  { %p736_p5 = scmp.ne.s32.totalorder %s53_s26, %s735_s29  ;;  %p741_p7 = scmp.lt.s32.totalorder %s735_s29, %s735_s29 }
  0x13   :  { %p742_p8 = por %p741_p7, %p740_p6 }
  0x15   :  { %p743_p9 = pnand %p742_p8, %p736_p5 }
  0x17   :  { %746 = shalt.err (!%p743_p9)
}
  0x18   :  { %s818_s30 = smov 64   ;;  %s819_s6 = smov 4  }
  0x19   :  { %58 = dma.hbm_to_vmem [thread:$0]  %s880_s3, 1024, %s53_s26, [#allocation8], %s818_s30, %s818_s30, %s819_s6  }
  0x1a   :  { %s755_s1 = scalar_lea.vmem %s20_s28, 128  ;;  %p760_p11 = scmp.lt.s32.totalorder %s20_s28, %s20_s28 }
  0x1b   :  { %p756_p10 = scmp.ne.s32.totalorder %s20_s28, %s755_s1  ;;  %p761_p12 = scmp.lt.s32.totalorder %s755_s1, %s755_s1 }
  0x1d   :  { %p762_p13 = por %p761_p12, %p760_p11 }
  0x1f   :  { %p763_p0 = pnand %p762_p13, %p756_p10 }
  0x21   :  { %766 = shalt.err (!%p763_p0)
}
  0x22   :  { %22 = dma.hbm_to_vmem [thread:$0]  %s877_s0, 128, %s20_s28, [#allocation3]  }
  0x23   :  { %s820_s11 = smov [#allocation6]   ;;  %s821_s13 = smov [#allocation9]  }
  0x24   :  { %s40_s12 = sshll.u32 %s820_s11, 4  ;;  %s65_s14 = sshll.u32 %s821_s13, 4  ;;  %s41_s12 = int_to_ptr.vmem [resolvable:$true] %s40_s12  ;;  %s66_s14 = int_to_ptr.vmem [resolvable:$true] %s65_s14 }
  0x25   :  { %s775_s15 = scalar_lea.vmem %s41_s12, 2048  ;;  %p780_p2 = scmp.lt.s32.totalorder %s41_s12, %s41_s12 }
  0x26   :  { %p776_p1 = scmp.ne.s32.totalorder %s41_s12, %s775_s15  ;;  %p781_p3 = scmp.lt.s32.totalorder %s775_s15, %s775_s15 }
  0x28   :  { %p782_p4 = por %p781_p3, %p780_p2 }
  0x2a   :  { %p783_p5 = pnand %p782_p4, %p776_p1 }
  0x2c   :  { %786 = shalt.err (!%p783_p5)
}
  0x2d   :  { %46 = dma.hbm_to_vmem [thread:$0]  %s879_s2, 2048, %s41_s12, [#allocation5], %s818_s30, %s818_s30, %s819_s6  }
  0x2e   :  { %s795_s17 = scalar_lea.vmem %s66_s14, 128  ;;  %p800_p7 = scmp.lt.s32.totalorder %s66_s14, %s66_s14 }
  0x2f   :  { %p796_p6 = scmp.ne.s32.totalorder %s66_s14, %s795_s17  ;;  %p801_p8 = scmp.lt.s32.totalorder %s795_s17, %s795_s17 }
  0x31   :  { %p802_p9 = por %p801_p8, %p800_p7 }
  0x33   :  { %p803_p10 = pnand %p802_p9, %p796_p6 }
  0x35   :  { %806 = shalt.err (!%p803_p10)
}
  0x36   :  { %68 = dma.hbm_to_vmem [thread:$0]  %s881_s4, 128, %s66_s14, [#allocation8]  }
  0x37   :  { %807 = dma.done.wait [#allocation3], 128  }
  0x38   :  { %808 = vsyncadd [#allocation3], 4294967168 }
  0x39   :  { %809 = dma.done.wait [#allocation5], 3840  }
  0x3a   :  { %810 = vsyncadd [#allocation5], 4294963456 }
  0x3b   :  { %811 = dma.done.wait [#allocation8], 1152  }
  0x3c   :  { %812 = vsyncadd [#allocation8], 4294966144  ;;  %v822_v0 = vmov 0   ;;  %vm193_vm0 = vcmask 1045504   ;;  %v661_v3 = vld [vmem:[#allocation4 + $0x54] ss:$8 sps:$4 sm:$0xff]   ;;  %v103_v40 = vlaneseq }
  0x3d   :  { %232 = vmatprep.mubr.bf16.mxu0 %v822_v0  ;;  %v658_v1 = vld [vmem:[#allocation4 + $0x64] ss:$8 sps:$4 sm:$0x3f]   ;;  %v660_v2 = vld [vmem:[#allocation4 + $0x60] ss:$8 sps:$4 sm:$0x3f]  }
  0x3e   :  { %568 = vmatprep.subr.msk.bf16.mxu0 %vm193_vm0, %v658_v1  ;;  %v195_v4 = vsel %vm193_vm0, %v660_v2, 0  ;;  %v663_v5 = vld [vmem:[#allocation4 + $0x50] ss:$8 sps:$4 sm:$0xff]   ;;  %v664_v6 = vld [vmem:[#allocation4 + $0x44] ss:$8 sps:$4 sm:$0xff]   ;;  %vm189_vm1 = vcmask 883712  }
  0x3f   :  { %203 = vmatpush1.bf16.msra.mxu0 %v195_v4  ;;  %v666_v7 = vld [vmem:[#allocation4 + $0x40] ss:$8 sps:$4 sm:$0xff]   ;;  %v667_v8 = vld [vmem:[#allocation4 + $0x34] ss:$8 sps:$4 sm:$0xff]   ;;  %v669_v9 = vld [vmem:[#allocation4 + $0x30] ss:$8 sps:$4 sm:$0xff]  }
  0x40   :  { %204 = vmatprep.subr.bf16.mxu0 %v661_v3  ;;  %v679_v10 = vld [vmem:[#allocation6 + $0x78] sm:$0xff]   ;;  %v681_v13 = vld [vmem:[#allocation6 + $0x70] sm:$0xff]   ;;  %v683_v15 = vld [vmem:[#allocation6 + $0x68] sm:$0xff]   ;;  %v823_v35 = vmov 0.0   ;;  %v104_v41 = vshrl.u32 %v103_v40, 7  ;;  %vm824_vm2 = vmmov 0  }
  0x41   :  { %v670_v11 = vld [vmem:[#allocation4 + $0x24] ss:$8 sps:$4 sm:$0xff]   ;;  %595 = vmatprep.subr.bf16.mxu1 %v679_v10  ;;  %v672_v16 = vld [vmem:[#allocation4 + $0x20] ss:$8 sps:$4 sm:$0xff]   ;;  %v673_v17 = vld [vmem:[#allocation4 + $0x14] ss:$8 sps:$4 sm:$0xff]  }
  0x42   :  { %v680_v12 = vld [vmem:[#allocation6 + $0x38] sm:$0xff]   ;;  %v682_v14 = vld [vmem:[#allocation6 + $0x30] sm:$0xff]   ;;  %v684_v18 = vld [vmem:[#allocation6 + $0x28] sm:$0xff]   ;;  %v105_v42 = vsub.s32 0, %v104_v41  ;;  %v109_v44 = vsub.s32 4, %v104_v41  ;;  %v279_v62 = vsub.s32 1, %v104_v41 }
  0x43   :  { %205 = vmatpush1.bf16.msra.mxu0 %v663_v5  ;;  %596 = vmatpush3.bf16.msra.mxu1 %v680_v12  ;;  %v685_v19 = vld [vmem:[#allocation6 + $0x60] sm:$0xff]   ;;  %v676_v21 = vld [vmem:[#allocation4 + $0x4] ss:$8 sps:$4 sm:$0xff]   ;;  %v678_v24 = vld [vmem:[#allocation4] ss:$8 sps:$4 sm:$0xff]  }
  0x44   :  { %206 = vmatprep.subr.bf16.mxu0 %v664_v6  ;;  %597 = vmatprep.subr.bf16.mxu1 %v681_v13  ;;  %v675_v20 = vld [vmem:[#allocation4 + $0x10] ss:$8 sps:$4 sm:$0xff]   ;;  %v687_v23 = vld [vmem:[#allocation6 + $0x58] sm:$0xff]   ;;  %v689_v27 = vld [vmem:[#allocation6 + $0x50] sm:$0xff]  }
  0x45   :  { %v686_v22 = vld [vmem:[#allocation6 + $0x20] sm:$0xff]   ;;  %v85_v25 = vld [vmem:[#allocation2] sm:$0xff]  ;;  %v688_v26 = vld [vmem:[#allocation6 + $0x18] sm:$0xff]  }
  0x46   :  { %v86_v28 = vpack.c.bf16 %v85_v25, %v85_v25  ;;  %v690_v29 = vld [vmem:[#allocation6 + $0x10] sm:$0xff]   ;;  %v691_v30 = vld [vmem:[#allocation6 + $0x48] sm:$0xff]   ;;  %v693_v32 = vld [vmem:[#allocation6 + $0x40] sm:$0xff]  }
  0x47   :  { %207 = vmatpush1.bf16.msra.mxu0 %v666_v7  ;;  %598 = vmatpush3.bf16.msra.mxu1 %v682_v14  ;;  %v692_v31 = vld [vmem:[#allocation6 + $0x8] sm:$0xff]   ;;  %v694_v33 = vld [vmem:[#allocation6] sm:$0xff]   ;;  %v695_v34 = vld [vmem:[#allocation7 + $0x38] sm:$0xff]  }
  0x48   :  { %208 = vmatprep.subr.bf16.mxu0 %v667_v8  ;;  %599 = vmatprep.subr.bf16.mxu1 %v683_v15  ;;  %v696_v36 = vld [vmem:[#allocation7 + $0x30] sm:$0xff]   ;;  %v697_v37 = vld [vmem:[#allocation7 + $0x28] sm:$0xff]   ;;  %v698_v38 = vld [vmem:[#allocation7 + $0x20] sm:$0xff]   ;;  %v437_v8 = vsub.s32 2, %v104_v41 }
  0x49   :  { %v699_v39 = vld [vmem:[#allocation7 + $0x18] sm:$0xff]   ;;  %v87_v43 = vld [vmem:[#allocation9] sm:$0x77]  ;;  %v700_v59 = vld [vmem:[#allocation7 + $0x10] sm:$0xff]  }
  0x4a   :  { %v106_v45 = vrot.slane %v87_v43, %v105_v42  ;;  %v110_v46 = vrot.slane %v87_v43, %v109_v44  ;;  %v701_v60 = vld [vmem:[#allocation7 + $0x8] sm:$0xff]   ;;  %v702_v61 = vld [vmem:[#allocation7] sm:$0xff]   ;;  %v280_v0 = vrot.slane %v87_v43, %v279_v62  ;;  %v438_v10 = vrot.slane %v87_v43, %v437_v8 }
  0x4b   :  { %209 = vmatpush1.bf16.msra.mxu0 %v669_v9  ;;  %600 = vmatpush3.bf16.msra.mxu1 %v684_v18  ;;  %v528_v9 = vand.u32 127, %v103_v40 }
  0x4c   :  { %210 = vmatprep.subr.bf16.mxu0 %v670_v11  ;;  %601 = vmatprep.subr.bf16.mxu1 %v685_v19  ;;  %v116_v47 = vrot.slane %v106_v45, %v105_v42  ;;  %v120_v48 = vrot.slane %v110_v46, %v105_v42 }
  0x4d   :  { %vm529_vm3 = vcmp.ge.s32.totalorder %v528_v9, 3  ;;  %vm530_vm4 = vcmp.lt.s32.totalorder %v528_v9, 6 }
  0x4e   :  { %vm531_vm5 = vmand %vm529_vm3, %vm530_vm4 }
  0x4f   :  { %211 = vmatpush1.bf16.msra.mxu0 %v672_v16  ;;  %602 = vmatpush3.bf16.msra.mxu1 %v686_v22 }
  0x50   :  { %212 = vmatprep.subr.bf16.mxu0 %v673_v17  ;;  %603 = vmatprep.subr.bf16.mxu1 %v687_v23 }
  0x53   :  { %213 = vmatpush1.bf16.msra.mxu0 %v675_v20  ;;  %604 = vmatpush3.bf16.msra.mxu1 %v688_v26 }
  0x54   :  { %214 = vmatprep.subr.bf16.mxu0 %v676_v21  ;;  %605 = vmatprep.subr.bf16.mxu1 %v689_v27 }
  0x57   :  { %215 = vmatpush1.bf16.msra.mxu0 %v678_v24  ;;  %606 = vmatpush3.bf16.msra.mxu1 %v690_v29 }
  0x58   :  { %607 = vmatprep.subr.bf16.mxu1 %v691_v30  ;;  %626 = vmatprep.subr.bf16.mxu0 %v823_v35 }
  0x5a   :  { %569 = vmatmul.mubr.msk.bf16.vlgmr.msra.gmra.mxu0 %vm189_vm1, %v86_v28 }
  0x5b   :  { %608 = vmatpush3.bf16.msra.mxu1 %v692_v31  ;;  %627 = vmatpush3.bf16.msra.mxu0 %v695_v34 }
  0x5c   :  { %609 = vmatprep.subr.bf16.mxu1 %v693_v32  ;;  %628 = vmatprep.subr.bf16.mxu0 %v823_v35 }
  0x5d   :  { %642 = vmatprep.mubr.msk.bf16.mxu0 %vm824_vm2, %v823_v35 }
  0x5f   :  { %610 = vmatpush3.bf16.msra.mxu1 %v694_v33  ;;  %629 = vmatpush3.bf16.msra.mxu0 %v696_v36 }
  0x60   :  { %630 = vmatprep.subr.bf16.mxu0 %v823_v35 }
  0x63   :  { %631 = vmatpush3.bf16.msra.mxu0 %v697_v37 }
  0x64   :  { %632 = vmatprep.subr.bf16.mxu0 %v823_v35 }
  0x67   :  { %633 = vmatpush3.bf16.msra.mxu0 %v698_v38 }
  0x68   :  { %634 = vmatprep.subr.bf16.mxu0 %v823_v35 }
  0x6b   :  { %635 = vmatpush3.bf16.msra.mxu0 %v699_v39 }
  0x6c   :  { %636 = vmatprep.subr.bf16.mxu0 %v823_v35 }
  0x6f   :  { %637 = vmatpush3.bf16.msra.mxu0 %v700_v59 }
  0x70   :  { %638 = vmatprep.subr.bf16.mxu0 %v823_v35 }
  0x73   :  { %639 = vmatpush3.bf16.msra.mxu0 %v701_v60 }
  0x74   :  { %640 = vmatprep.subr.bf16.mxu0 %v823_v35 }
  0x77   :  { %641 = vmatpush3.bf16.msra.mxu0 %v702_v61 }
 0x11a   :  { %v234_v49 = vpop.f32.mrf.mxu0 }
 0x11b   :  { %v235_v50 = vadd.f32 %v234_v49, %v116_v47 }
 0x11c   :  { %v236_v51 = vpop.f32.mrf.mxu0 }
 0x11d   :  { %v237_v52 = vadd.f32 %v236_v51, %v120_v48  ;;  %v241_v53 = vmax.f32 %v235_v50, 0.0 }
 0x11e   :  { %v238_v54 = vpop.f32.mrf.mxu0 }
 0x11f   :  { %v242_v55 = vmax.f32 %v237_v52, 0.0  ;;  %v243_v58 = vpack.c.bf16 %v241_v53, %v241_v53 }
 0x120   :  { %v239_v56 = vpop.f32.mrf.mxu0 }
 0x121   :  { %v244_v57 = vpack.c.bf16 %v242_v55, %v242_v55 }
 0x123   :  { %409 = vmatprep.mubr.bf16.mxu1 %v244_v57 }
 0x124   :  { %410 = vmatmul.mubr.bf16.vlgmr.msra.gmra.mxu1 %v243_v58 }
 0x1e4   :  { %v611_v63 = vpop.f32.mrf.mxu1 }
 0x1e6   :  { %v612_v1 = vpop.f32.mrf.mxu1 }
 0x1e7   :  { %v613_v2 = vadd.f32 %v612_v1, %v611_v63 }
 0x1e8   :  { %v614_v3 = vpop.f32.mrf.mxu1 }
 0x1e9   :  { %v412_v4 = vadd.f32 %v613_v2, %v280_v0 }
 0x1ea   :  { %v615_v5 = vpop.f32.mrf.mxu1 }
 0x1eb   :  { %v417_v6 = vmax.f32 %v412_v4, 0.0 }
 0x1ed   :  { %v418_v7 = vpack.c.bf16 %v417_v6, %v417_v6 }
 0x1ef   :  { %643 = vmatmul.mubr.bf16.vlgmr.msra.gmra.mxu0 %v418_v7 }
 0x2af   :  { %v521_v11 = vpop.f32.mrf.mxu0 }
 0x2b0   :  { %v522_v12 = vadd.f32 %v521_v11, %v438_v10 }
 0x2b1   :  { %v644_v13 = vpop.f32.mrf.mxu0 }
 0x2b2   :  { %544 = vst [vmem:[%s882_s5] sm:$0xff] %v522_v12  ;;  %v532_v14 = vsel %vm531_vm5, %v522_v12, -inf }
 0x2b3   :  { %533 = vmax.xlane.f32.xlu0 %v532_v14  ;;  %v524_v15 = vpop.f32.mrf.mxu0 }
 0x2b5   :  { %v645_v16 = vpop.f32.mrf.mxu0 }
 0x33c   :  { %v534_v17 = vpop.xlane.xlu0 %533 }
 0x33d   :  { %v535_v18 = vsub.f32 %v522_v12, %v534_v17 }
 0x33f   :  { %v536_v19 = vsel %vm531_vm5, %v535_v18, -inf }
 0x340   :  { %v537_v20 = vmul.f32 1.442695, %v536_v19 }
 0x342   :  { %703 = vpow2.f32 %v537_v20 }
 0x34f   :  { %v704_v21 = vpop.eup %703 }
 0x350   :  { %539 = vadd.xlane.f32.xlu0 %v704_v21 }
 0x3d9   :  { %v540_v22 = vpop.xlane.xlu0 %539 }
 0x3da   :  { %705 = vlog2.f32 %v540_v22 }
 0x3e7   :  { %v706_v23 = vpop.eup %705 }
 0x3e8   :  { %v542_v24 = vmul.f32 0.6931472, %v706_v23 }
 0x3ea   :  { %v543_v25 = vsub.f32 %v535_v18, %v542_v24 }
 0x3ec   :  { %594 = vst [vmem:[%s882_s5 + $0x8] sm:$0xff] %v543_v25 }
 0x3ed   :  { %551 = vsyncpa [#allocation3], 1 }
 0x3ee   :  { %552 = vsyncpa [#allocation5], 1 }
 0x3ef   :  { %553 = vsyncpa [#allocation8], 1 }

</bundles_post_ra>
